<compile_context>
chip_gen: v7x
topology: tpu7x:2x2x1
jax: 0.10.0
libtpu: 0.0.40
codegen_flags: <defaults>
</compile_context>

<pallas_src>
import functools

import jax
import jax.numpy as jnp
from jax import lax
from jax.experimental import pallas as pl
from jax.experimental.pallas import tpu as pltpu


def _round_up(a: int, b: int) -> int:
    return (a + b - 1) // b * b


def _vmem_ceiling_bytes() -> int:
    """3/4 of physical VMEM when queryable, else a value safe on every chip."""
    try:
        info = pltpu.get_tpu_info()
        cap = getattr(info, "vmem_capacity_bytes", None)
        if cap:
            return int(cap) * 3 // 4
    except Exception:
        pass
    return 48 * 2**20          # below v7x's 64 MiB physical; fine on v5e/v6e


def _conv_act_stats_kernel(xa_ref, xb_ref, w_ref, b_ref,
                           y_ref, sum_ref, sumsq_ref, *,
                           kernel_size: int, dilation: int, fold_taps: bool,
                           lt: int, lout_true: int, mask_tail: bool):
    """One (batch, cout-tile, time-tile) block of dilated Conv1d + bias +
    LeakyReLU, accumulating per-(batch, cout-tile) BatchNorm partial sums
    across the innermost ("arbitrary") time axis."""
    j = pl.program_id(2)

    @pl.when(j == 0)
    def _init():
        sum_ref[...] = jnp.zeros_like(sum_ref)
        sumsq_ref[...] = jnp.zeros_like(sumsq_ref)

    # Haloed input window for this time tile: main lt lanes + halo lanes.
    x_win = jnp.concatenate([xa_ref[0], xb_ref[0]], axis=-1)   # (Cin, lt+halo)

    if fold_taps:
        # Thin channels: stack taps along the contraction axis -> one deep
        # MXU matmul (Cout_tile, K*Cin) @ (K*Cin, lt).
        x_stack = jnp.concatenate(
            [x_win[:, k * dilation:k * dilation + lt]
             for k in range(kernel_size)], axis=0)
        y = jnp.dot(w_ref[...], x_stack, preferred_element_type=jnp.float32)
    else:
        # Wide channels: per-tap matmuls, plain accumulation chain (v7x MRB
        # accumulates in place; no intermediate reshapes/casts between taps).
        y = jnp.dot(w_ref[0], x_win[:, :lt], preferred_element_type=jnp.float32)
        for k in range(1, kernel_size):
            y = y + jnp.dot(w_ref[k], x_win[:, k * dilation:k * dilation + lt],
                            preferred_element_type=jnp.float32)

    y = y + b_ref[...]                       # (co, lt) + (co, 1), f32
    y = jnp.where(y >= 0, y, 0.01 * y)       # LeakyReLU (default slope 0.01)
    y_ref[0] = y.astype(y_ref.dtype)

    # BatchNorm partial sums in f32; interior tiles need no validity mask.
    # TODO(synk): switch to a centered / Welford combine if B*L grows so large
    # that E[x^2]-E[x]^2 cancellation in f32 exceeds tolerance.
    if mask_tail:
        is_last = j == pl.num_programs(2) - 1

        @pl.when(jnp.logical_not(is_last))
        def _interior():
            sum_ref[0] += jnp.sum(y, axis=-1, keepdims=True)
            sumsq_ref[0] += jnp.sum(y * y, axis=-1, keepdims=True)

        @pl.when(is_last)
        def _tail():
            col = j * lt + lax.broadcasted_iota(jnp.int32, (1, lt), 1)
            ym = jnp.where(col < lout_true, y, 0.0)
            sum_ref[0] += jnp.sum(ym, axis=-1, keepdims=True)
            sumsq_ref[0] += jnp.sum(ym * ym, axis=-1, keepdims=True)
    else:
        sum_ref[0] += jnp.sum(y, axis=-1, keepdims=True)
        sumsq_ref[0] += jnp.sum(y * y, axis=-1, keepdims=True)


def _bn_apply_kernel(y_ref, scale_ref, shift_ref, o_ref):
    """Finalized BatchNorm affine transform, per (batch, cout, time) tile."""
    y = y_ref[0].astype(jnp.float32)
    o_ref[0] = (y * scale_ref[...] + shift_ref[...]).astype(o_ref.dtype)


def tdnn_block(x, weight, bias, gamma, beta, *, kernel_size: int,
               dilation: int, time_tile: int = 512, eps: float = 1e-5,
               interm_dtype=None):
    """x: (B, Cin, L); weight: (Cout, Cin, K). Returns (B, Cout, Lout) with
    Lout = L - dilation*(K-1). Matches Conv1d -> LeakyReLU -> BatchNorm1d
    (training-mode batch statistics, biased variance, eps=1e-5)."""
    B, Cin, L = x.shape
    Cout, Cin_w, K = weight.shape
    assert Cin_w == Cin and K == kernel_size
    lout = L - dilation * (kernel_size - 1)
    assert lout > 0, "input too short for this kernel_size/dilation"

    interm_dtype = x.dtype if interm_dtype is None else interm_dtype
    out_dtype = x.dtype
    halo = dilation * (kernel_size - 1)
    halo_blk = max(128, _round_up(halo, 128))        # blocked halo granularity

    # Adaptive, lane-dense time tile to minimise dead padded columns.
    n_t_target = max(1, pl.cdiv(lout, max(time_tile, 128)))
    lt = _round_up(pl.cdiv(lout, n_t_target), halo_blk)
    n_t = pl.cdiv(lout, lt)
    lout_pad = n_t * lt
    mask_tail = lout_pad != lout

    # Channel padding to a sublane multiple keeps in-kernel tap stacking
    # aligned; thin channels use the K-fold contraction.
    Cin_p = _round_up(Cin, 8)
    fold_taps = Cin_p < 128

    # Cout tile keeps the f32 accumulator <= ~(256, lt).
    co = Cout
    while co > 256 and co % 16 == 0:
        co //= 2
    n_c = Cout // co

    # Pad x once (channels to Cin_p; time so every main+halo block is in
    # bounds).  TODO(synk): fold this pad and the final time slice into the
    # kernels (masked tail DMA / masked store) to save one HBM pass each.
    L_pad = lout_pad + halo_blk
    x_p = jnp.pad(x, ((0, 0), (0, Cin_p - Cin), (0, L_pad - L)))
    w_p = jnp.pad(weight, ((0, 0), (0, Cin_p - Cin), (0, 0)))
    if fold_taps:
        w_op = jnp.transpose(w_p, (0, 2, 1)).reshape(Cout, K * Cin_p)
        w_spec = pl.BlockSpec((co, K * Cin_p), lambda b, c, j: (c, 0))
    else:
        w_op = jnp.transpose(w_p, (2, 0, 1))          # (K, Cout, Cin_p)
        w_spec = pl.BlockSpec((K, co, Cin_p), lambda b, c, j: (0, c, 0))
    bias2 = bias.reshape(Cout, 1).astype(jnp.float32)

    isz_x = jnp.dtype(x.dtype).itemsize
    isz_y = jnp.dtype(interm_dtype).itemsize
    isz_o = jnp.dtype(out_dtype).itemsize
    ceiling = _vmem_ceiling_bytes()

    # ---- Pass 1: conv + LeakyReLU + streaming BN partial sums -------------
    blk1 = (Cin_p * (lt + halo_blk) * isz_x + K * Cin_p * co * isz_x
            + co * lt * isz_y + 3 * co * 4)
    tmp1 = (kernel_size + 1) * Cin_p * (lt + halo_blk) * isz_x + co * lt * 4
    vmem1 = int(min(ceiling, max(2 * blk1 + tmp1 + (8 << 20), 32 << 20)))

    flops1 = 2 * B * Cout * K * Cin_p * lout_pad
    bytes1 = int(B * n_c * Cin_p * (lout_pad + n_t * halo_blk) * isz_x
                 + B * Cout * lout_pad * isz_y
                 + K * Cin_p * Cout * isz_x + B * Cout * 2 * 4)

    kernel1 = functools.partial(
        _conv_act_stats_kernel, kernel_size=kernel_size, dilation=dilation,
        fold_taps=fold_taps, lt=lt, lout_true=lout, mask_tail=mask_tail)

    y, s1, s2 = pl.pallas_call(
        kernel1,
        out_shape=(jax.ShapeDtypeStruct((B, Cout, lout_pad), interm_dtype),
                   jax.ShapeDtypeStruct((B, Cout, 1), jnp.float32),
                   jax.ShapeDtypeStruct((B, Cout, 1), jnp.float32)),
        grid=(B, n_c, n_t),
        in_specs=[
            pl.BlockSpec((1, Cin_p, lt), lambda b, c, j: (b, 0, j)),        # x
            pl.BlockSpec((1, Cin_p, halo_blk),                              # halo
                         lambda b, c, j: (b, 0, (j + 1) * (lt // halo_blk))),
            w_spec,                                                         # W
            pl.BlockSpec((co, 1), lambda b, c, j: (c, 0)),                  # bias
        ],
        out_specs=(
            pl.BlockSpec((1, co, lt), lambda b, c, j: (b, c, j)),           # y
            pl.BlockSpec((1, co, 1), lambda b, c, j: (b, c, 0)),            # sum
            pl.BlockSpec((1, co, 1), lambda b, c, j: (b, c, 0)),            # sumsq
        ),
        compiler_params=pltpu.CompilerParams(
            dimension_semantics=("parallel", "parallel", "arbitrary"),
            vmem_limit_bytes=vmem1),
        cost_estimate=pl.CostEstimate(flops=flops1, transcendentals=0,
                                      bytes_accessed=bytes1),
    )(x_p, x_p, w_op, bias2)

    # ---- Finalize BN statistics (tiny per-channel reduction, plain JAX) ---
    n = jnp.float32(B * lout)
    mean = jnp.sum(s1, axis=(0, 2)) / n                            # (Cout,)
    var = jnp.maximum(jnp.sum(s2, axis=(0, 2)) / n - mean * mean, 0.0)
    inv_std = lax.rsqrt(var + eps)
    g32 = gamma.astype(jnp.float32)
    scale = (g32 * inv_std).reshape(Cout, 1)
    shift = (beta.astype(jnp.float32) - mean * g32 * inv_std).reshape(Cout, 1)

    # ---- Pass 2: pure-bandwidth affine normalisation (big, halo-free tiles)
    lt2 = lt
    for d in range(1, n_t + 1):
        if n_t % d == 0 and d * lt <= max(4096, lt):
            lt2 = d * lt
    co2 = Cout
    while co2 % 16 == 0 and co2 * lt2 * max(isz_y, 4) > (2 << 20):
        co2 //= 2
    blk2 = co2 * lt2 * (isz_y + isz_o) + 2 * co2 * 4
    vmem2 = int(min(ceiling, max(4 * blk2 + (8 << 20), 32 << 20)))
    bytes2 = int(B * Cout * lout_pad * (isz_y + isz_o) + Cout * 8)

    out = pl.pallas_call(
        _bn_apply_kernel,
        out_shape=jax.ShapeDtypeStruct((B, Cout, lout_pad), out_dtype),
        grid=(B, Cout // co2, lout_pad // lt2),
        in_specs=[
            pl.BlockSpec((1, co2, lt2), lambda b, c, t: (b, c, t)),
            pl.BlockSpec((co2, 1), lambda b, c, t: (c, 0)),
            pl.BlockSpec((co2, 1), lambda b, c, t: (c, 0)),
        ],
        out_specs=pl.BlockSpec((1, co2, lt2), lambda b, c, t: (b, c, t)),
        compiler_params=pltpu.CompilerParams(
            dimension_semantics=("parallel", "parallel", "parallel"),
            vmem_limit_bytes=vmem2),
        cost_estimate=pl.CostEstimate(flops=2 * B * Cout * lout_pad,
                                      transcendentals=0,
                                      bytes_accessed=bytes2),
    )(y, scale, shift)

    return out[:, :, :lout]


def _reference(x, weight, bias, gamma, beta, *, dilation):
    """Pure-JAX reference of the PyTorch forward (training-mode BN)."""
    y = lax.conv_general_dilated(
        x, weight, window_strides=(1,), padding="VALID",
        rhs_dilation=(dilation,), dimension_numbers=("NCH", "OIH", "NCH"))
    y = y + bias.reshape(1, -1, 1)
    y = jnp.where(y >= 0, y, 0.01 * y)
    mean = jnp.mean(y, axis=(0, 2), keepdims=True)
    var = jnp.mean((y - mean) ** 2, axis=(0, 2), keepdims=True)
    y = (y - mean) * lax.rsqrt(var + 1e-5)
    return y * gamma.reshape(1, -1, 1) + beta.reshape(1, -1, 1)


def _run_case(key, *, B, Cin, Cout, L, K, dil, time_tile, interm_dtype,
              atol, rtol):
    kx, kw, kb, kg, kbe = jax.random.split(key, 5)
    x = jax.random.normal(kx, (B, Cin, L), dtype=jnp.float32)
    weight = jax.random.normal(kw, (Cout, Cin, K), dtype=jnp.float32)
    weight = weight * (1.0 / (Cin * K) ** 0.5)
    bias = 0.1 * jax.random.normal(kb, (Cout,), dtype=jnp.float32)
    gamma = 1.0 + 0.1 * jax.random.normal(kg, (Cout,), dtype=jnp.float32)
    beta = 0.1 * jax.random.normal(kbe, (Cout,), dtype=jnp.float32)

    out = tdnn_block(x, weight, bias, gamma, beta, kernel_size=K,
                     dilation=dil, time_tile=time_tile,
                     interm_dtype=interm_dtype)
    out = jax.block_until_ready(out)

    ref = _reference(x, weight, bias, gamma, beta, dilation=dil)
    assert out.shape == (B, Cout, L - dil * (K - 1)), out.shape
    assert jnp.allclose(out, ref, atol=atol, rtol=rtol), (
        f"mismatch vs reference: max abs diff "
        f"{float(jnp.max(jnp.abs(out - ref)))}")


if __name__ == "__main__":
    key = jax.random.PRNGKey(0)
    k1, k2, k3 = jax.random.split(key, 3)

    # Thin channels (K-fold MXU path), multiple time tiles + tail masking.
    _run_case(k1, B=2, Cin=4, Cout=8, L=160, K=3, dil=2, time_tile=128,
              interm_dtype=None, atol=1e-4, rtol=1e-4)
    # Wide channels (per-tap accumulation path, haloed tiles).
    _run_case(k2, B=2, Cin=128, Cout=16, L=140, K=3, dil=1, time_tile=128,
              interm_dtype=None, atol=1e-4, rtol=1e-4)
    # bf16 intermediate (halves HBM traffic of the two-pass BatchNorm).
    _run_case(k3, B=2, Cin=4, Cout=8, L=160, K=3, dil=2, time_tile=128,
              interm_dtype=jnp.bfloat16, atol=1e-1, rtol=5e-2)

    print("KERNEL_OK")
</pallas_src>

<mosaic_0001>
module attributes {stable_mosaic.version = 11 : i64} {
  func.func @_conv_act_stats_kernel(%arg0: i32, %arg1: i32, %arg2: i32, %arg3: memref<1x8x128xf32, #tpu.memory_space<vmem>>, %arg4: memref<1x8x128xf32, #tpu.memory_space<vmem>>, %arg5: memref<8x24xf32, #tpu.memory_space<vmem>>, %arg6: memref<8x1xf32, #tpu.memory_space<vmem>>, %arg7: memref<1x8x128xf32, #tpu.memory_space<vmem>>, %arg8: memref<1x8x1xf32, #tpu.memory_space<vmem>>, %arg9: memref<1x8x1xf32, #tpu.memory_space<vmem>>) attributes {dimension_semantics = [#tpu.dimension_semantics<parallel>, #tpu.dimension_semantics<parallel>, #tpu.dimension_semantics<arbitrary>], iteration_bounds = array<i64: 2, 1, 2>, scalar_prefetch = 0 : i64, scratch_operands = 0 : i64, tpu.core_type = #tpu.core_type<tc>, window_params = [{transform_indices = @transform_0, window_bounds = array<i64: 1, 8, 128>}, {transform_indices = @transform_1, window_bounds = array<i64: 1, 8, 128>}, {transform_indices = @transform_2, window_bounds = array<i64: 8, 24>}, {transform_indices = @transform_3, window_bounds = array<i64: 8, 1>}, {transform_indices = @transform_4, window_bounds = array<i64: 1, 8, 128>}, {transform_indices = @transform_5, window_bounds = array<i64: 1, 8, 1>}, {transform_indices = @transform_6, window_bounds = array<i64: 1, 8, 1>}]} {
    %c0_i32 = arith.constant 0 : i32
    %0 = arith.cmpi eq, %arg2, %c0_i32 : i32
    %1 = arith.extui %0 : i1 to i32
    %c0_i32_0 = arith.constant 0 : i32
    %2 = arith.cmpi ne, %1, %c0_i32_0 : i32
    scf.if %2 {
      %cst_17 = arith.constant 0.000000e+00 : f32
      %31 = vector.broadcast %cst_17 : f32 to vector<1x8x1xf32>
      %c0_18 = arith.constant 0 : index
      %c0_19 = arith.constant 0 : index
      %c0_20 = arith.constant 0 : index
      %32 = vector.load %arg8[%c0_18, %c0_19, %c0_20] : memref<1x8x1xf32, #tpu.memory_space<vmem>>, vector<1x8x1xf32>
      tpu.vector_store %arg8[%c0_18, %c0_19, %c0_20], %31 {strides = array<i32>} : memref<1x8x1xf32, #tpu.memory_space<vmem>>, vector<1x8x1xf32>,
      %cst_21 = arith.constant 0.000000e+00 : f32
      %33 = vector.broadcast %cst_21 : f32 to vector<1x8x1xf32>
      %c0_22 = arith.constant 0 : index
      %c0_23 = arith.constant 0 : index
      %c0_24 = arith.constant 0 : index
      %34 = vector.load %arg9[%c0_22, %c0_23, %c0_24] : memref<1x8x1xf32, #tpu.memory_space<vmem>>, vector<1x8x1xf32>
      tpu.vector_store %arg9[%c0_22, %c0_23, %c0_24], %33 {strides = array<i32>} : memref<1x8x1xf32, #tpu.memory_space<vmem>>, vector<1x8x1xf32>,
    } else {
    }
    %c0 = arith.constant 0 : index
    %c0_1 = arith.constant 0 : index
    %c0_2 = arith.constant 0 : index
    %3 = vector.load %arg3[%c0, %c0_1, %c0_2] : memref<1x8x128xf32, #tpu.memory_space<vmem>>, vector<1x8x128xf32>
    %4 = vector.shape_cast %3 : vector<1x8x128xf32> to vector<8x128xf32>
    %c0_3 = arith.constant 0 : index
    %c0_4 = arith.constant 0 : index
    %c0_5 = arith.constant 0 : index
    %5 = vector.load %arg4[%c0_3, %c0_4, %c0_5] : memref<1x8x128xf32, #tpu.memory_space<vmem>>, vector<1x8x128xf32>
    %6 = vector.shape_cast %5 : vector<1x8x128xf32> to vector<8x128xf32>
    %7 = tpu.concatenate %4, %6 in 1 : vector<8x128xf32>, vector<8x128xf32> -> vector<8x256xf32>
    %8 = vector.extract_strided_slice %7 {offsets = [0, 0], sizes = [8, 128], strides = [1, 1]} : vector<8x256xf32> to vector<8x128xf32>
    %9 = vector.extract_strided_slice %7 {offsets = [0, 2], sizes = [8, 128], strides = [1, 1]} : vector<8x256xf32> to vector<8x128xf32>
    %10 = vector.extract_strided_slice %7 {offsets = [0, 4], sizes = [8, 128], strides = [1, 1]} : vector<8x256xf32> to vector<8x128xf32>
    %11 = tpu.concatenate %8, %9, %10 in 0 : vector<8x128xf32>, vector<8x128xf32>, vector<8x128xf32> -> vector<24x128xf32>
    %c0_6 = arith.constant 0 : index
    %c0_7 = arith.constant 0 : index
    %12 = vector.load %arg5[%c0_6, %c0_7] : memref<8x24xf32, #tpu.memory_space<vmem>>, vector<8x24xf32>
    %cst = arith.constant dense<0.000000e+00> : vector<8x128xf32>
    %13 = tpu.matmul %12, %11, %cst {dimension_numbers = #tpu.dot_dimension_numbers<[1], [0], [0], [1], [0, 0, 1, 1], [], []>} : vector<8x24xf32>, vector<24x128xf32>, vector<8x128xf32> -> vector<8x128xf32>
    %c0_8 = arith.constant 0 : index
    %c0_9 = arith.constant 0 : index
    %14 = vector.load %arg6[%c0_8, %c0_9] : memref<8x1xf32, #tpu.memory_space<vmem>>, vector<8x1xf32>
    %15 = vector.broadcast %14 : vector<8x1xf32> to vector<8x128xf32>
    %16 = arith.addf %13, %15 : vector<8x128xf32>
    %cst_10 = arith.constant 0.000000e+00 : f32
    %17 = vector.broadcast %cst_10 : f32 to vector<8x128xf32>
    %18 = arith.cmpf oge, %16, %17 : vector<8x128xf32>
    %cst_11 = arith.constant 0.00999999977 : f32
    %19 = vector.broadcast %cst_11 : f32 to vector<8x128xf32>
    %20 = arith.mulf %19, %16 : vector<8x128xf32>
    %21 = arith.select %18, %16, %20 : vector<8x128xi1>, vector<8x128xf32>
    %c0_12 = arith.constant 0 : index
    %c0_13 = arith.constant 0 : index
    %c0_14 = arith.constant 0 : index
    %22 = vector.load %arg7[%c0_12, %c0_13, %c0_14] : memref<1x8x128xf32, #tpu.memory_space<vmem>>, vector<1x8x128xf32>
    %23 = vector.shape_cast %22 : vector<1x8x128xf32> to vector<8x128xf32>
    %24 = vector.shape_cast %21 : vector<8x128xf32> to vector<1x8x128xf32>
    tpu.vector_store %arg7[%c0_12, %c0_13, %c0_14], %24 {strides = array<i32>} : memref<1x8x128xf32, #tpu.memory_space<vmem>>, vector<1x8x128xf32>,
    %c1_i32 = arith.constant 1 : i32
    %25 = arith.cmpi eq, %arg2, %c1_i32 : i32
    %true = arith.constant true
    %26 = arith.xori %25, %true : i1
    %27 = arith.extui %26 : i1 to i32
    %c0_i32_15 = arith.constant 0 : i32
    %28 = arith.cmpi ne, %27, %c0_i32_15 : i32
    scf.if %28 {
      %c0_17 = arith.constant 0 : index
      %c0_18 = arith.constant 0 : index
      %c0_19 = arith.constant 0 : index
      %31 = vector.load %arg8[%c0_17, %c0_18, %c0_19] : memref<1x8x1xf32, #tpu.memory_space<vmem>>, vector<1x8x1xf32>
      %32 = vector.shape_cast %31 : vector<1x8x1xf32> to vector<8x1xf32>
      %cst_20 = arith.constant dense<0.000000e+00> : vector<8xf32>
      %33 = vector.multi_reduction <add>, %21, %cst_20 [1] : vector<8x128xf32> to vector<8xf32>
      %34 = vector.shape_cast %33 : vector<8xf32> to vector<8x1xf32>
      %35 = arith.addf %32, %34 : vector<8x1xf32>
      %c0_21 = arith.constant 0 : index
      %c0_22 = arith.constant 0 : index
      %c0_23 = arith.constant 0 : index
      %36 = vector.load %arg8[%c0_21, %c0_22, %c0_23] : memref<1x8x1xf32, #tpu.memory_space<vmem>>, vector<1x8x1xf32>
      %37 = vector.shape_cast %36 : vector<1x8x1xf32> to vector<8x1xf32>
      %38 = vector.shape_cast %35 : vector<8x1xf32> to vector<1x8x1xf32>
      tpu.vector_store %arg8[%c0_21, %c0_22, %c0_23], %38 {strides = array<i32>} : memref<1x8x1xf32, #tpu.memory_space<vmem>>, vector<1x8x1xf32>,
      %c0_24 = arith.constant 0 : index
      %c0_25 = arith.constant 0 : index
      %c0_26 = arith.constant 0 : index
      %39 = vector.load %arg9[%c0_24, %c0_25, %c0_26] : memref<1x8x1xf32, #tpu.memory_space<vmem>>, vector<1x8x1xf32>
      %40 = vector.shape_cast %39 : vector<1x8x1xf32> to vector<8x1xf32>
      %41 = arith.mulf %21, %21 : vector<8x128xf32>
      %cst_27 = arith.constant dense<0.000000e+00> : vector<8xf32>
      %42 = vector.multi_reduction <add>, %41, %cst_27 [1] : vector<8x128xf32> to vector<8xf32>
      %43 = vector.shape_cast %42 : vector<8xf32> to vector<8x1xf32>
      %44 = arith.addf %40, %43 : vector<8x1xf32>
      %c0_28 = arith.constant 0 : index
      %c0_29 = arith.constant 0 : index
      %c0_30 = arith.constant 0 : index
      %45 = vector.load %arg9[%c0_28, %c0_29, %c0_30] : memref<1x8x1xf32, #tpu.memory_space<vmem>>, vector<1x8x1xf32>
      %46 = vector.shape_cast %45 : vector<1x8x1xf32> to vector<8x1xf32>
      %47 = vector.shape_cast %44 : vector<8x1xf32> to vector<1x8x1xf32>
      tpu.vector_store %arg9[%c0_28, %c0_29, %c0_30], %47 {strides = array<i32>} : memref<1x8x1xf32, #tpu.memory_space<vmem>>, vector<1x8x1xf32>,
    } else {
    }
    %29 = arith.extui %25 : i1 to i32
    %c0_i32_16 = arith.constant 0 : i32
    %30 = arith.cmpi ne, %29, %c0_i32_16 : i32
    scf.if %30 {
      %c128_i32 = arith.constant 128 : i32
      %31 = arith.muli %arg2, %c128_i32 : i32
      %32 = tpu.iota {dimensions = array<i32: 1>} : vector<1x128xi32>
      %33 = vector.broadcast %31 : i32 to vector<1x128xi32>
      %34 = arith.addi %33, %32 : vector<1x128xi32>
      %c156_i32 = arith.constant 156 : i32
      %35 = vector.broadcast %c156_i32 : i32 to vector<1x128xi32>
      %36 = arith.cmpi slt, %34, %35 : vector<1x128xi32>
      %cst_17 = arith.constant 0.000000e+00 : f32
      %37 = vector.shape_cast %36 : vector<1x128xi1> to vector<1x128xi1>
      %38 = vector.broadcast %37 : vector<1x128xi1> to vector<8x128xi1>
      %39 = vector.broadcast %cst_17 : f32 to vector<8x128xf32>
      %40 = arith.select %38, %21, %39 : vector<8x128xi1>, vector<8x128xf32>
      %c0_18 = arith.constant 0 : index
      %c0_19 = arith.constant 0 : index
      %c0_20 = arith.constant 0 : index
      %41 = vector.load %arg8[%c0_18, %c0_19, %c0_20] : memref<1x8x1xf32, #tpu.memory_space<vmem>>, vector<1x8x1xf32>
      %42 = vector.shape_cast %41 : vector<1x8x1xf32> to vector<8x1xf32>
      %cst_21 = arith.constant dense<0.000000e+00> : vector<8xf32>
      %43 = vector.multi_reduction <add>, %40, %cst_21 [1] : vector<8x128xf32> to vector<8xf32>
      %44 = vector.shape_cast %43 : vector<8xf32> to vector<8x1xf32>
      %45 = arith.addf %42, %44 : vector<8x1xf32>
      %c0_22 = arith.constant 0 : index
      %c0_23 = arith.constant 0 : index
      %c0_24 = arith.constant 0 : index
      %46 = vector.load %arg8[%c0_22, %c0_23, %c0_24] : memref<1x8x1xf32, #tpu.memory_space<vmem>>, vector<1x8x1xf32>
      %47 = vector.shape_cast %46 : vector<1x8x1xf32> to vector<8x1xf32>
      %48 = vector.shape_cast %45 : vector<8x1xf32> to vector<1x8x1xf32>
      tpu.vector_store %arg8[%c0_22, %c0_23, %c0_24], %48 {strides = array<i32>} : memref<1x8x1xf32, #tpu.memory_space<vmem>>, vector<1x8x1xf32>,
      %c0_25 = arith.constant 0 : index
      %c0_26 = arith.constant 0 : index
      %c0_27 = arith.constant 0 : index
      %49 = vector.load %arg9[%c0_25, %c0_26, %c0_27] : memref<1x8x1xf32, #tpu.memory_space<vmem>>, vector<1x8x1xf32>
      %50 = vector.shape_cast %49 : vector<1x8x1xf32> to vector<8x1xf32>
      %51 = arith.mulf %40, %40 : vector<8x128xf32>
      %cst_28 = arith.constant dense<0.000000e+00> : vector<8xf32>
      %52 = vector.multi_reduction <add>, %51, %cst_28 [1] : vector<8x128xf32> to vector<8xf32>
      %53 = vector.shape_cast %52 : vector<8xf32> to vector<8x1xf32>
      %54 = arith.addf %50, %53 : vector<8x1xf32>
      %c0_29 = arith.constant 0 : index
      %c0_30 = arith.constant 0 : index
      %c0_31 = arith.constant 0 : index
      %55 = vector.load %arg9[%c0_29, %c0_30, %c0_31] : memref<1x8x1xf32, #tpu.memory_space<vmem>>, vector<1x8x1xf32>
      %56 = vector.shape_cast %55 : vector<1x8x1xf32> to vector<8x1xf32>
      %57 = vector.shape_cast %54 : vector<8x1xf32> to vector<1x8x1xf32>
      tpu.vector_store %arg9[%c0_29, %c0_30, %c0_31], %57 {strides = array<i32>} : memref<1x8x1xf32, #tpu.memory_space<vmem>>, vector<1x8x1xf32>,
    } else {
    }
    return
  }
  func.func @transform_0(%arg0: i32, %arg1: i32, %arg2: i32) -> (i32, i32, i32) {
    %c0_i32 = arith.constant 0 : i32
    %c0_i32_0 = arith.constant 0 : i32
    return %arg0, %c0_i32, %arg2 : i32, i32, i32
  }
  func.func @transform_1(%arg0: i32, %arg1: i32, %arg2: i32) -> (i32, i32, i32) {
    %c1_i32 = arith.constant 1 : i32
    %0 = arith.addi %arg2, %c1_i32 : i32
    %c1_i32_0 = arith.constant 1 : i32
    %1 = arith.muli %0, %c1_i32_0 : i32
    %c0_i32 = arith.constant 0 : i32
    %c0_i32_1 = arith.constant 0 : i32
    return %arg0, %c0_i32, %1 : i32, i32, i32
  }
  func.func @transform_2(%arg0: i32, %arg1: i32, %arg2: i32) -> (i32, i32) {
    %c0_i32 = arith.constant 0 : i32
    %c0_i32_0 = arith.constant 0 : i32
    return %arg1, %c0_i32 : i32, i32
  }
  func.func @transform_3(%arg0: i32, %arg1: i32, %arg2: i32) -> (i32, i32) {
    %c0_i32 = arith.constant 0 : i32
    %c0_i32_0 = arith.constant 0 : i32
    return %arg1, %c0_i32 : i32, i32
  }
  func.func @transform_4(%arg0: i32, %arg1: i32, %arg2: i32) -> (i32, i32, i32) {
    %c0_i32 = arith.constant 0 : i32
    return %arg0, %arg1, %arg2 : i32, i32, i32
  }
  func.func @transform_5(%arg0: i32, %arg1: i32, %arg2: i32) -> (i32, i32, i32) {
    %c0_i32 = arith.constant 0 : i32
    %c0_i32_0 = arith.constant 0 : i32
    return %arg0, %arg1, %c0_i32 : i32, i32, i32
  }
  func.func @transform_6(%arg0: i32, %arg1: i32, %arg2: i32) -> (i32, i32, i32) {
    %c0_i32 = arith.constant 0 : i32
    %c0_i32_0 = arith.constant 0 : i32
    return %arg0, %arg1, %c0_i32 : i32, i32, i32
  }
}

</mosaic_0001>

<bundles_post_ra>
// kernel: tpu_custom_call.1
= control target key start
LH: loop header
LB: loop body
LE: loop exit
PB: predicated region body
PF: predicated region fallthrough
CT: control target
= control target key end

     0   :  { %s1551_s0 = inlined_call_operand.hbm [shape: f32[2,8,384], index: 0, kind: input, shape index: {}]   ;;  %s1552_s1 = inlined_call_operand.hbm [shape: f32[2,8,384], index: 1, kind: input, shape index: {}]   ;;  %s1553_s2 = inlined_call_operand.vmem [shape: f32[8,24], index: 2, kind: input, shape index: {}]   ;;  %s1554_s3 = inlined_call_operand.vmem [shape: f32[8,1], index: 3, kind: input, shape index: {}]   ;;  %s1555_s4 = inlined_call_operand.hbm [shape: f32[2,8,256], index: 4, kind: output, shape index: {0}]   ;;  %s1556_s5 = inlined_call_operand.vmem [shape: f32[2,8,1], index: 5, kind: output, shape index: {1}]   ;;  %s1557_s6 = inlined_call_operand.vmem [shape: f32[2,8,1], index: 6, kind: output, shape index: {2}]  }
   0x1   :  { %1570 = sst [smem:[#allocation16_spill]] %s1551_s0 }
   0x2   :  { %1571 = sst [smem:[#allocation17_spill]] %s1553_s2 }
   0x3   :  { %1572 = sst [smem:[#allocation18_spill]] %s1554_s3 }
   0x4   :  { %1573 = sst [smem:[#allocation19_spill]] %s1555_s4 }
   0x5   :  { %12 = vsyncpa [#allocation3], 0 }
   0x6   :  { %14 = vsyncpa [#allocation3 + $0x1], 0 }
   0x7   :  { %15 = vsyncpa [#allocation6], 0 }
   0x8   :  { %17 = vsyncpa [#allocation6 + $0x1], 0 }
   0x9   :  { %18 = vsyncpa [#allocation4], 0 }
   0xa   :  { %20 = vsyncpa [#allocation4 + $0x1], 0  ;;  %s1205_s21 = smov 0   ;;  %s1207_s22 = smov 0  }
   0xb   :  { %s1209_s23 = smov 0   ;;  %s1211_s24 = smov 0  }
   0xc   :  { %s1213_s25 = smov 0   ;;  %s1215_s26 = smov 0  }
   0xd   :  { %s1217_s27 = smov 0   ;;  %s1219_s28 = smov 0  }
   0xe   :  { %s1221_s29 = smov 0   ;;  %s1223_s30 = smov 0  }
   0xf   :  { %s1225_s7 = smov 0  }
  0x10 LB: > { %1574 = sst [smem:[#allocation11_spill]] %s1150_s29  ;;  %s807_s8 = sadd.s32 4294967295, %s1158_s7   ;;  %s1158_s7 = sphi %s1225_s7, %s26_s7   ;;  %s1154_s30 = sphi %s1223_s30, %s1613_s30   ;;  %s1150_s29 = sphi %s1221_s29, %s1605_s29   ;;  %s1146_s28 = sphi %s1219_s28, %s1604_s28   ;;  %s1142_s27 = sphi %s1217_s27, %s1603_s27   ;;  %s1138_s26 = sphi %s1215_s26, %s1612_s26   ;;  %s1134_s25 = sphi %s1213_s25, %s1611_s25   ;;  %s1130_s24 = sphi %s1211_s24, %s1610_s24   ;;  %s1126_s23 = sphi %s1209_s23, %s1609_s23   ;;  %s1122_s22 = sphi %s1207_s22, %s1608_s22   ;;  %s1118_s21 = sphi %s1205_s21, %s1607_s21  }
  0x11   : > { %1575 = sst [smem:[#allocation12_spill]] %s1154_s30  ;;  %s808_s9 = sadd.s32 4294967294, %s1158_s7  }
  0x12   : > { %s38_s10 = sadd.s32 1, %s1150_s29  ;;  %s45_s11 = sadd.s32 1, %s1154_s30 }
  0x13   : > { %p39_p0 = scmp.ge.s32.totalorder %s38_s10, 2  ;;  %s54_s12 = sadd.s32 1, %s1138_s26 }
  0x14   : > { %p61_p1 = scmp.ne.s32.totalorder %s1138_s26, %s1134_s25  ;;  %p1565_p2 = scmp.eq.s32.totalorder %s1158_s7, 0 }
  0x15   : > { %s1268_s13 = scalar_select %p39_p0, 0, %s38_s10  }
  0x16   : > { %s1615_s11 = smov (!%p39_p0, %s45_s11), %s1154_s30  ;;  %p1278_p3 = por %p1565_p2, %p61_p1 }
  0x17   : > { %1576 = sst [smem:[#allocation13_spill]] %s1268_s13  ;;  %s50_s14 = ssub.s32 %s1150_s29, %s1268_s13 }
  0x18   : > { %p47_p4 = scmp.ge.s32.totalorder %s1615_s11, 2  ;;  %p67_p5 = scmp.ne.s32.totalorder %s1134_s25, %s1130_s24 }
  0x19   : > { %p1284_p6 = scmp.eq.s32.totalorder %s807_s8, 0  ;;  %s78_s17 = sadd.s32 1, %s1268_s13 }
  0x1a   : > { %s1617_s11 = smov (%p47_p4, %s1615_s11), 0  ;;  %s80_s19 = ssub.s32 %s38_s10, %s78_s17 }
  0x1b   : > { %s1578_s16 = scalar_select %p1284_p6, 1, 0 }
  0x1c   : > { %1579 = sst [smem:[#allocation14_spill]] %s1617_s11  ;;  %p1296_p7 = por %p1284_p6, %p67_p5 }
  0x1d   : > { %s49_s20 = ssub.s32 %s1154_s30, %s1617_s11  ;;  %p177_p8 = scmp.eq.s32.totalorder %s807_s8, 3 }
  0x1e   : > { %s1580_s18 = scalar_select %p1296_p7, 1, 0 }
  0x1f   : > { %s51_s4 = sor.u32 %s50_s14, %s49_s20  ;;  %s81_s2 = sor.u32 %s80_s19, %s49_s20 }
  0x20   : > { %p52_p9 = scmp.eq.s32.totalorder %s51_s4, 0  ;;  %p1302_p10 = scmp.eq.s32.totalorder %s81_s2, 0 }
  0x21   : > { %p1309_p11 = por %p177_p8, %p61_p1  ;;  %p183_p12 = scmp.eq.s32.totalorder %s808_s9, 3 }
  0x22   : > { %s1314_s10 = scalar_select %p52_p9, %s1138_s26, %s54_s12  }
  0x23   : > { %s1582_s3 = scalar_select %p1309_p11, 1, 0 }
  0x24   : > { %1583 = sst [smem:[#allocation15_spill]] %s1314_s10  ;;  %p1319_p13 = por %p183_p12, %p67_p5 }
  0x25   : > { %p1564_p0 = scmp.lt.s32.totalorder %s1158_s7, 4  ;;  %s273_s4 = sand.u32 1, %s1138_s26  }
  0x26   : > { %s1584_s8 = scalar_select %p1319_p13, 1, 0 }
  0x27   : > { %s813_s2 = sshll.u32 %s273_s4, 3  ;;  %s849_s14 = smul.u32 3, %s1154_s30 }
  0x28   : > { %s277_s17 = scalar_lea.vmem [#allocation2], %s813_s2  ;;  %p1330_p1 = pnand %p1564_p0, %p1278_p3 }
  0x29   : > { %s286_s19 = sshll.u32 %s277_s17, 4  ;;  %s1335_s9 = sadd.s32 %s1150_s29, %s849_s14  ;;  %s1337_s19 = int_to_ptr.vmem [resolvable:$true] %s286_s19 }
  0x2a   : > { %s1563_s12 = sshll.u32 %s1335_s9, 7  ;;  %s1586_s0 = sld [smem:[#allocation16_spill]] }
  0x2b   : > { %s274_s15 = scalar_lea.sflag [#allocation3], %s273_s4  ;;  %p973_p5 = pneg %p1330_p1 }
  0x30   : > { %s1345_s2 = scalar_lea.hbm %s1586_s0, %s1563_s12  ;;  %s976_s30 = scalar_lea.hbm %s1586_s0, 768 }
  0x31   : > { %s971_s17 = scalar_lea.hbm %s1345_s2, 128  ;;  %p977_p12 = scmp.lt.u32.totalorder %s1345_s2, %s1586_s0 }
  0x32   : > { %p972_p4 = scmp.ne.s32.totalorder %s1345_s2, %s971_s17  ;;  %p978_p0 = scmp.lt.u32.totalorder %s976_s30, %s971_s17 }
  0x33   : > { %p980_p3 = scmp.lt.u32.totalorder %s971_s17, %s1345_s2 }
  0x34   : > { %p974_p8 = pnand %p973_p5, %p972_p4  ;;  %p979_p2 = por %p978_p0, %p977_p12 }
  0x36   : > { %p975_p9 = pneg %p974_p8  ;;  %p981_p13 = por %p980_p3, %p979_p2 }
  0x38   : > { %p982_p11 = pnand %p981_p13, %p975_p9 }
  0x3a   : > { %985 = shalt.err (!%p982_p11)
}
  0x3b   : > { %s986_s4 = scalar_lea.vmem %s1337_s19, 128  ;;  %s1160_s29 = smov [#allocation2]  }
  0x3c   : > { %p987_p4 = scmp.ne.s32.totalorder %s1337_s19, %s986_s4  ;;  %s991_s14 = sshll.u32 %s1160_s29, 4  ;;  %s992_s14 = int_to_ptr.vmem [resolvable:$false] %s991_s14 }
  0x3d   : > { %s993_s12 = scalar_lea.vmem %s992_s14, 256  ;;  %p994_p6 = scmp.lt.s32.totalorder %s1337_s19, %s992_s14 }
  0x3e   : > { %p989_p8 = pnand %p987_p4, %p973_p5  ;;  %p995_p0 = scmp.lt.s32.totalorder %s993_s12, %s986_s4 }
  0x40   : > { %p990_p7 = pneg %p989_p8  ;;  %p996_p12 = por %p995_p0, %p994_p6 }
  0x42   : > { %p997_p2 = pnand %p996_p12, %p990_p7 }
  0x44   : > { %1000 = shalt.err (!%p997_p2)
}
  0x45   : > { %859 = dma.hbm_to_vmem [thread:$0]  (!%p1330_p1), %s1345_s2, 128, %s1337_s19, %s274_s15  }
  0x46   : > { %p312_p6 = scmp.lt.s32.totalorder %s1158_s7, 5  ;;  %p1587_p7 = scmp.ge.s32.totalorder %s1158_s7, 1 }
  0x47   : > { %s84_s17 = sadd.s32 1, %s1126_s23  ;;  %p91_p13 = scmp.ne.s32.totalorder %s1126_s23, %s1122_s22 }
  0x48   : > { %p1376_p11 = pnand %p1587_p7, %p312_p6  ;;  %p1589_p3 = scmp.eq.s32.totalorder %s1158_s7, 0 }
  0x49   : > { %s1386_s30 = scalar_select %p1302_p10, %s1126_s23, %s84_s17  }
  0x4a   : > { %p93_p5 = por %p91_p13, %p1589_p3  ;;  %p97_p9 = scmp.ne.s32.totalorder %s1122_s22, %s1118_s21 }
  0x4b   : > { %s293_s11 = sand.u32 1, %s1126_s23   ;;  %s1590_s4 = sshll.u32 %s1335_s9, 7 }
  0x4c   : > { %s663_s19 = scalar_lea.hbm %s1552_s1, %s1590_s4  ;;  %p1591_p1 = scmp.ne.s32.totalorder %s1578_s16, 0 }
  0x4d   : > { %s815_s15 = sshll.u32 %s293_s11, 3  ;;  %s1404_s12 = scalar_lea.hbm %s663_s19, 128 }
  0x4e   : > { %p1400_p4 = por %p97_p9, %p1591_p1  ;;  %p1593_p8 = scmp.lt.s32.totalorder %s1158_s7, 4 }
  0x4f   : > { %s297_s13 = scalar_lea.vmem [#allocation5], %s815_s15  ;;  %s294_s16 = scalar_lea.sflag [#allocation6], %s293_s11 }
  0x50   : > { %s1592_s2 = scalar_select %p1400_p4, 1, 0 }
  0x51   : > { %p1408_p10 = pnand %p1593_p8, %p93_p5  ;;  %s307_s9 = sshll.u32 %s297_s13, 4  ;;  %s1412_s9 = int_to_ptr.vmem [resolvable:$true] %s307_s9 }
  0x52   : > { %s1031_s17 = scalar_lea.hbm %s663_s19, 256  ;;  %s1006_s14 = scalar_lea.hbm %s1552_s1, 768 }
  0x53   : > { %p1002_p0 = scmp.ne.s32.totalorder %s1404_s12, %s1031_s17  ;;  %p1003_p12 = pneg %p1408_p10 }
  0x54   : > { %p1007_p7 = scmp.lt.u32.totalorder %s1404_s12, %s1552_s1  ;;  %p1008_p13 = scmp.lt.u32.totalorder %s1006_s14, %s1031_s17 }
  0x55   : > { %p1004_p2 = pnand %p1003_p12, %p1002_p0  ;;  %p1010_p5 = scmp.lt.u32.totalorder %s1031_s17, %s1404_s12 }
  0x56   : > { %p1009_p3 = por %p1008_p13, %p1007_p7 }
  0x57   : > { %p1005_p6 = pneg %p1004_p2 }
  0x58   : > { %p1011_p9 = por %p1010_p5, %p1009_p3 }
  0x5a   : > { %p1012_p1 = pnand %p1011_p9, %p1005_p6 }
  0x5c   : > { %1015 = shalt.err (!%p1012_p1)
}
  0x5d   : > { %s1016_s11 = scalar_lea.vmem %s1412_s9, 128  ;;  %s1161_s19 = smov [#allocation5]  }
  0x5e   : > { %p1017_p8 = scmp.ne.s32.totalorder %s1412_s9, %s1016_s11  ;;  %s1021_s15 = sshll.u32 %s1161_s19, 4  ;;  %s1022_s15 = int_to_ptr.vmem [resolvable:$false] %s1021_s15 }
  0x5f   : > { %s1023_s0 = scalar_lea.vmem %s1022_s15, 256  ;;  %p1024_p4 = scmp.lt.s32.totalorder %s1412_s9, %s1022_s15 }
  0x60   : > { %p1019_p0 = pnand %p1017_p8, %p1003_p12  ;;  %p1025_p7 = scmp.lt.s32.totalorder %s1023_s0, %s1016_s11 }
  0x62   : > { %p1020_p2 = pneg %p1019_p0  ;;  %p1026_p13 = por %p1025_p7, %p1024_p4 }
  0x64   : > { %p1027_p3 = pnand %p1026_p13, %p1020_p2 }
  0x66   : > { %1030 = shalt.err (!%p1027_p3)
}
  0x67   : > { %862 = dma.hbm_to_vmem [thread:$0]  (!%p1408_p10), %s1404_s12, 128, %s1412_s9, %s294_s16  }
  0x68   : > { %316 = sbr.rel (%p1376_p11) target bundleno = 805 (0x325), region = 36  ;;  %s1441_s10 = sand.u32 (!%p1376_p11), 1, %s1134_s25  }
  0x69   : > { %s818_s13 = sshll.u32 (!%p1376_p11), %s1441_s10, 3  ;;  %s319_s17 = scalar_lea.sflag (!%p1376_p11), [#allocation3], %s1441_s10 }
  0x6a   : > { %s322_s4 = scalar_lea.vmem (!%p1376_p11), [#allocation2], %s818_s13  ;;  %p1595_p4 = scmp.ne.s32.totalorder (!%p1376_p11), %s1580_s18, 0 }
  0x6f   : > { %1105 = dma.done.wait (%p1595_p4), %s319_s17, 128  }
  0x70   : > { %1107 = vsyncadd (%p1595_p4), %s319_s17, 4294967168  ;;  %s327_s12 = sand.u32 1, %s1122_s22   ;;  %p1596_p11 = scmp.ne.s32.totalorder %s1592_s2, 0 }
  0x71   : > { %s819_s21 = sshll.u32 %s327_s12, 3  ;;  %s328_s20 = scalar_lea.sflag [#allocation6], %s327_s12 }
  0x72   : > { %s331_s9 = scalar_lea.vmem [#allocation5], %s819_s21 }
  0x73   : > { %1109 = dma.done.wait (%p1596_p11), %s328_s20, 128  }
  0x74   : > { %1111 = vsyncadd (%p1596_p11), %s328_s20, 4294967168  ;;  %p396_p10 = scmp.lt.s32.totalorder %s1146_s28, 1  ;;  %s1466_s17 = scalar_lea.vmem [#allocation7], %s818_s13 }
  0x75   : > { %p823_p12 = scmp.ne.s32.totalorder %s1142_s27, 0 }
  0x76   : > { %s397_s16 = scalar_select %p396_p10, %s1146_s28, 1 }
  0x77   : > { %413 = sbr.rel (%p823_p12) target bundleno = 126 (0x7e), region = 48  ;;  %vm414_vm0 = vcmask (!%p823_p12), 7168   ;;  %v1162_v0 = vmov (!%p823_p12), 0.0  }
  0x78   : > { %s821_s29 = sshll.u32 %s397_s16, 3 }
  0x79   : > { %s1459_s18 = scalar_lea.vmem %s1556_s5, %s821_s29  ;;  %s1464_s0 = scalar_lea.vmem %s1557_s6, %s821_s29 }
  0x7a   : > { %415 = vst.msk [vmem:[%s1459_s18] sm:$0xff] (!%p823_p12), %vm414_vm0, %v1162_v0  ;;  %416 = vst.msk [vmem:[%s1464_s0] sm:$0xff] (!%p823_p12), %vm414_vm0, %v1162_v0 }
  0x7e PF: > { %v417_v1 = vld [vmem:[%s322_s4] sm:$0xff]  ;;  %v418_v2 = vld [vmem:[%s331_s9] sm:$0xff]  ;;  %s1163_s2 = smov 124   ;;  %v1164_v4 = vmov 0.0|0.0   ;;  %vm1165_vm1 = vmmov 0   ;;  %v1166_v5 = vmov 0.0  }
  0x7f   : > { %v964_v3 = vpack.i.bf16 %v418_v2, %v417_v1  ;;  %430 = vrot.lane.b32.xlu1 %v418_v2, %s1163_s2  ;;  %846 = vmatprep.subr.bf16.mxu0 %v1164_v4  ;;  %s1597_s21 = sld [smem:[#allocation18_spill]]  ;;  %s1167_s20 = smov 126   ;;  %v1168_v7 = vmov 0   ;;  %vm425_vm2 = vcmask 1031168   ;;  %vm432_vm3 = vcmask 1014784  }
  0x80   : > { %843 = vmatprep.mubr.msk.f32.mxu0 %vm1165_vm1, %v1166_v5  ;;  %969 = vset.pattern.permute.xlu1 %v1168_v7  ;;  %s1598_s16 = sld [smem:[#allocation17_spill]]  ;;  %vm442_vm4 = vcmask 195584   ;;  %p825_p6 = scmp.eq.s32.totalorder %s1142_s27, 1 }
  0x81   : > { %965 = vrot.lane.b32.xlu0 %v964_v3, %s1167_s20  ;;  %v525_v24 = vld [vmem:[%s1459_s18] sm:$0xff] (!%p825_p6)  ;;  %vm529_vm6 = vcmask (!%p825_p6), 7168  }
  0x82   : > { %970 = vset.pattern.permute.xlu0 %v1168_v7  ;;  %v531_v27 = vld [vmem:[%s1464_s0] sm:$0xff] (!%p825_p6) }
  0x85   : > { %v436_v6 = vld [vmem:[%s1597_s21] sm:$0xff]  ;;  %428 = vrot.lane.b32.xlu0 %v417_v1, %s1163_s2 }
  0x86   : > { %439 = vperm.xlu1 %969, %v436_v6   ;;  %v435_v16 = vld [vmem:[%s1598_s16] sm:$0xff] }
  0xf1   : > { %v431_v13 = vpop.permute.xlu1 %430 }
  0xf3   : > { %v966_v8 = vpop.permute.xlu0 %965 }
  0xf4   : > { %v968_v9 = vunpack.i.h.bf16 %v966_v8  ;;  %v967_v10 = vunpack.i.l.bf16 %v966_v8 }
  0xf6   : > { %v426_v11 = vsel %vm425_vm2, %v967_v10, %v968_v9 }
  0xf7   : > { %v847_v12 = vpack.c.bf16 %v426_v11, %v417_v1  ;;  %v429_v14 = vpop.permute.xlu0 %428 }
  0xf8   : > { %v433_v15 = vsel %vm432_vm3, %v429_v14, %v431_v13 }
  0xf9   : > { %848 = vmatpush3.bf16.msra.mxu0 %v847_v12 }
  0xfa   : > { %841 = vmatprep.subr.mxu0 %v1166_v5 }
  0xfd   : > { %842 = vmatpush3.msra.mxu0 %v433_v15 }
  0xfe   : > { %844 = vmatmul.mubr.msk.f32.vlgmr.msra.gmra.mrb[0].mxu0 %vm442_vm4, %v435_v16 }
 0x105   : > { %v440_v17 = vpop.permute.xlu1 %439 }
 0x1d1   : > { %v512_v18 = vpop.f32.mrb[0].mxu0  ;;  %524 = sbr.rel (%p825_p6) target bundleno = 620 (0x26c), region = 52 }
 0x1d2   : > { %v513_v19 = vadd.f32 %v512_v18, %v440_v17  ;;  %v845_v20 = vpop.f32.mrb[1].mxu0 }
 0x1d4   : > { %vm516_vm5 = vcmp.ge.f32.partialorder %v513_v19, 0.0  ;;  %v517_v21 = vmul.f32 0.01, %v513_v19 }
 0x1d6   : > { %v518_v22 = vsel %vm516_vm5, %v513_v19, %v517_v21 }
 0x1d7   : > { %519 = vst [vmem:[%s1466_s17] sm:$0xff] %v518_v22  ;;  %526 = vadd.xlane.f32.xlu0 (!%p825_p6), %v518_v22  ;;  %v532_v23 = vmul.f32 (!%p825_p6), %v518_v22, %v518_v22 }
 0x1db   : > { %533 = vadd.xlane.f32.xlu0 %v532_v23 }
 0x264   : > { %v527_v25 = vpop.xlane.xlu0 %526 }
 0x265   : > { %v528_v26 = vadd.f32 %v527_v25, %v525_v24 }
 0x267   : > { %530 = vst.msk [vmem:[%s1459_s18] sm:$0xff] %vm529_vm6, %v528_v26 }
 0x268   : > { %v534_v28 = vpop.xlane.xlu0 %533 }
 0x269   : > { %v535_v29 = vadd.f32 %v534_v28, %v531_v27 }
 0x26b   : > { %536 = vst.msk [vmem:[%s1464_s0] sm:$0xff] %vm529_vm6, %v535_v29 }
 0x26c PF: > { %p826_p5 = scmp.ne.s32.totalorder %s1142_s27, 1 }
 0x26d   : > { %s827_s29 = sshll.u32 (!%p826_p5), %s1142_s27, 7  ;;  %v541_v30 = vlaneseq (!%p826_p5)  ;;  %vm553_vm8 = vcmask (!%p826_p5), 7168  }
 0x26e   : > { %539 = sbr.rel (%p826_p5) target bundleno = 778 (0x30a), region = 56  ;;  %v543_v31 = vstv (!%p826_p5), %s827_s29  ;;  %v549_v36 = vld [vmem:[%s1459_s18] sm:$0xff] (!%p826_p5) }
 0x26f   : > { %v542_v32 = vand.u32 (!%p826_p5), 127, %v541_v30 }
 0x271   : > { %v544_v33 = vadd.s32 (!%p826_p5), %v543_v31, %v542_v32 }
 0x272   : > { %v555_v39 = vld [vmem:[%s1464_s0] sm:$0xff] (!%p826_p5) }
 0x273   : > { %vm545_vm7 = vcmp.lt.s32.totalorder (!%p826_p5), %v544_v33, 156 }
 0x274   : > { %v548_v34 = vsel (!%p826_p5), %vm545_vm7, %v518_v22, 0.0 }
 0x275   : > { %550 = vadd.xlane.f32.xlu0 %v548_v34  ;;  %v556_v35 = vmul.f32 %v548_v34, %v548_v34 }
 0x279   : > { %557 = vadd.xlane.f32.xlu0 %v556_v35 }
 0x302   : > { %v551_v37 = vpop.xlane.xlu0 %550 }
 0x303   : > { %v552_v38 = vadd.f32 %v551_v37, %v549_v36 }
 0x305   : > { %554 = vst.msk [vmem:[%s1459_s18] sm:$0xff] %vm553_vm8, %v552_v38 }
 0x306   : > { %v558_v40 = vpop.xlane.xlu0 %557 }
 0x307   : > { %v559_v41 = vadd.f32 %v558_v40, %v555_v39 }
 0x309   : > { %560 = vst.msk [vmem:[%s1464_s0] sm:$0xff] %vm553_vm8, %v559_v41 }
 0x30a PF: > { %s829_s14 = sshll.u32 %s1146_s28, 1  ;;  %s593_s19 = sshll.u32 %s1466_s17, 4  ;;  %s1492_s19 = int_to_ptr.vmem [resolvable:$true] %s593_s19 }
 0x30b   : > { %s589_s11 = sadd.s32 %s1142_s27, %s829_s14  ;;  %s1599_s12 = sld [smem:[#allocation19_spill]] }
 0x30c   : > { %s830_s15 = sshll.u32 %s589_s11, 7  ;;  %s562_s0 = scalar_lea.sflag [#allocation4], %s1441_s10 }
 0x30d   : > { %s1032_s21 = scalar_lea.vmem %s1492_s19, 128  ;;  %p1600_p1 = scmp.ne.s32.totalorder %s1582_s3, 0 }
 0x30e   : > { %p1033_p9 = scmp.ne.s32.totalorder %s1492_s19, %s1032_s21  ;;  %s1169_s20 = smov [#allocation7]  }
 0x30f   : > { %s1036_s28 = sshll.u32 %s1169_s20, 4  ;;  %s1037_s28 = int_to_ptr.vmem [resolvable:$false] %s1036_s28 }
 0x310   : > { %p1034_p8 = pnand %p1033_p9, %p1600_p1  ;;  %s1038_s27 = scalar_lea.vmem %s1037_s28, 256 }
 0x311   : > { %s591_s18 = scalar_lea.hbm %s1599_s12, %s830_s15  ;;  %p1039_p2 = scmp.lt.s32.totalorder %s1492_s19, %s1037_s28 }
 0x312   : > { %p1035_p0 = pneg %p1034_p8  ;;  %p1040_p7 = scmp.lt.s32.totalorder %s1038_s27, %s1032_s21 }
 0x314   : > { %p1041_p13 = por %p1040_p7, %p1039_p2 }
 0x316   : > { %p1042_p3 = pnand %p1041_p13, %p1035_p0 }
 0x318   : > { %1045 = shalt.err (!%p1042_p3)
}
 0x319   : > { %s1046_s17 = scalar_lea.hbm %s591_s18, 128  ;;  %s1050_s9 = scalar_lea.hbm %s1599_s12, 512 }
 0x31a   : > { %p1047_p4 = scmp.ne.s32.totalorder %s591_s18, %s1046_s17  ;;  %p1051_p12 = scmp.lt.u32.totalorder %s591_s18, %s1599_s12 }
 0x31b   : > { %p1052_p6 = scmp.lt.u32.totalorder %s1050_s9, %s1046_s17  ;;  %p1054_p9 = scmp.lt.u32.totalorder %s1046_s17, %s591_s18 }
 0x31c   : > { %p1048_p11 = pnand %p1047_p4, %p1600_p1 }
 0x31d   : > { %p1053_p5 = por %p1052_p6, %p1051_p12 }
 0x31e   : > { %p1049_p10 = pneg %p1048_p11 }
 0x31f   : > { %p1055_p8 = por %p1054_p9, %p1053_p5 }
 0x321   : > { %p1056_p0 = pnand %p1055_p8, %p1049_p10 }
 0x323   : > { %1059 = shalt.err (!%p1056_p0)
}
 0x324   : > { %854 = dma.vmem_to_hbm [thread:$0]  (%p1600_p1), %s1492_s19, 128, %s591_s18, %s562_s0  }
 0x325 PF: > { %p868_p2 = scmp.ge.s32.totalorder %s1158_s7, 2  ;;  %s611_s14 = sand.u32 1, %s1130_s24  }
 0x326   : > { %p1601_p7 = scmp.ne.s32.totalorder %s1584_s8, 0  ;;  %s612_s11 = scalar_lea.sflag [#allocation4], %s611_s14 }
 0x328   : > { %p864_p13 = pnand %p868_p2, %p1601_p7 }
 0x32a   : > { %1113 = dma.done.wait (!%p864_p13), %s612_s11, 128  }
 0x32b   : > { %1115 = vsyncadd (!%p864_p13), %s612_s11, 4294967168  ;;  %s26_s7 = sadd.s32 1, %s1158_s7   ;;  %s1602_s3 = sld [smem:[#allocation15_spill]] }
 0x32c   : > { %p23_p3 = scmp.ge.s32.totalorder %s26_s7, 6   ;;  %s1603_s27 = sld [smem:[#allocation11_spill]] }
 0x32d   : > { %s1604_s28 = sld [smem:[#allocation12_spill]]  ;;  %s1605_s29 = sld [smem:[#allocation13_spill]] }
 0x32e   : > { %s1606_s19 = sld [smem:[#allocation14_spill]]  ;;  %s1607_s21 = smov %s1122_s22 }
 0x32f   : > { %s1608_s22 = smov %s1126_s23  ;;  %s1609_s23 = smov %s1386_s30 }
 0x330   : > { %s1610_s24 = smov %s1134_s25  ;;  %s1611_s25 = smov %s1138_s26 }
 0x331   : > { %s1612_s26 = smov %s1602_s3  ;;  %25 = sbr.rel (!%p23_p3) target bundleno = 16 (0x10), region = 136 }
 0x334   : > { %s1613_s30 = smov %s1606_s19 }
 0x338   :  { %637 = vsyncpa [#allocation3], 1 }
 0x339   :  { %639 = vsyncpa [#allocation3 + $0x1], 1 }
 0x33a   :  { %640 = vsyncpa [#allocation6], 1 }
 0x33b   :  { %642 = vsyncpa [#allocation6 + $0x1], 1 }
 0x33c   :  { %643 = vsyncpa [#allocation4], 1 }
 0x33d   :  { %645 = vsyncpa [#allocation4 + $0x1], 1 }

</bundles_post_ra>
